<compile_context>
chip_gen: v7x
topology: tpu7x:2x2x1
jax: 0.10.0
libtpu: 0.0.40
codegen_flags: <defaults>
</compile_context>

<pallas_src>
import jax
import jax.numpy as jnp
from jax.experimental import pallas as pl
from jax.experimental.pallas import tpu as pltpu

EPS = 1e-5
K = 3  # 3x3 convolution


def _resblock_kernel(x_ref, w1_ref, w2_ref, g1_ref, b1_ref, g2_ref, b2_ref,
                     gmat_ref, gspread_ref, out_ref):
    N, H, WC = x_ref.shape          # lane-dense activations: (N, H, W*C)
    Cout = gmat_ref.shape[1]
    W = WC // Cout
    NH = N * H
    inv_cnt = 1.0 / float(NH * W)   # BN count = N*H*W

    x = x_ref[...]                  # (N, H, W*Cin) f32
    gmat = gmat_ref[...]            # (W*Cout, Cout): lane-group -> channel reduce
    gspread = gspread_ref[...]      # (Cout, W*Cout): channel -> lane broadcast

    def conv_slab(v):
        # Build (N*H, 3*W*C) slab: rows h-1, h, h+1 concatenated along lanes.
        # H zero-padding comes from the zero row; W zero-padding is encoded in
        # the banded weight matrix.
        zero = jnp.zeros((N, 1, WC), jnp.float32)
        up = jnp.concatenate([zero, v[:, :H - 1, :]], axis=1)   # input row h-1
        dn = jnp.concatenate([v[:, 1:, :], zero], axis=1)       # input row h+1
        return jnp.concatenate([up, v, dn], axis=2).reshape(NH, 3 * WC)

    def bn_coeffs(acc, gamma, beta):
        # One-pass batch stats: per-lane sum / sum-of-squares, then reduce the
        # W lane-groups to per-channel values with a tiny one-hot matmul.
        s = jnp.sum(acc, axis=0, keepdims=True)                  # (1, W*Cout)
        ss = jnp.sum(acc * acc, axis=0, keepdims=True)           # (1, W*Cout)
        s_c = jnp.dot(s, gmat, preferred_element_type=jnp.float32)    # (1, Cout)
        ss_c = jnp.dot(ss, gmat, preferred_element_type=jnp.float32)  # (1, Cout)
        mean_c = s_c * inv_cnt
        var_c = ss_c * inv_cnt - mean_c * mean_c                 # biased variance
        a_c = jax.lax.rsqrt(var_c + EPS) * gamma                 # scale per channel
        c_c = beta - mean_c * a_c                                # shift per channel
        # Broadcast back into the lane-folded layout (again via one-hot matmul).
        a_wc = jnp.dot(a_c, gspread, preferred_element_type=jnp.float32)  # (1, WC)
        c_wc = jnp.dot(c_c, gspread, preferred_element_type=jnp.float32)  # (1, WC)
        return a_wc, c_wc

    # ---- conv1: single MXU matmul, K = 3*W*Cin ----
    acc1 = jnp.dot(conv_slab(x), w1_ref[...],
                   preferred_element_type=jnp.float32)           # (N*H, W*Cout)

    # ---- bn1 + ReLU ----
    a1, c1 = bn_coeffs(acc1, g1_ref[...], b1_ref[...])
    h1 = jnp.maximum(acc1 * a1 + c1, 0.0)

    # ---- conv2: single MXU matmul ----
    acc2 = jnp.dot(conv_slab(h1.reshape(N, H, WC)), w2_ref[...],
                   preferred_element_type=jnp.float32)           # (N*H, W*Cout)

    # ---- bn2 ----
    a2, c2 = bn_coeffs(acc2, g2_ref[...], b2_ref[...])
    h2 = acc2 * a2 + c2

    # ---- residual add (downsample=None) + ReLU ----
    out = jnp.maximum(h2 + x.reshape(NH, WC), 0.0)
    out_ref[...] = out.reshape(N, H, WC)


def _banded_weight(w_oihw, W):
    """OIHW 3x3 weight -> banded (3*W*Cin, W*Cout) matrix for the lane-folded conv.

    B[kh*W*Cin + w_in*Cin + ci, w*Cout + co] = w[co, ci, kh, w_in - w + 1]
    (zero outside the band), so conv == slab @ B with W-padding built in.
    """
    Cout, Cin, KH, KW = w_oihw.shape
    wt = jnp.transpose(w_oihw, (2, 3, 1, 0)).astype(jnp.float32)  # (KH, KW, Cin, Cout)
    blocks = []
    for kh in range(KH):
        b = sum(jnp.kron(jnp.eye(W, k=1 - kw, dtype=jnp.float32), wt[kh, kw])
                for kw in range(KW))                              # (W*Cin, W*Cout)
        blocks.append(b)
    return jnp.concatenate(blocks, axis=0)                        # (KH*W*Cin, W*Cout)


def residual_block_forward(x_nchw, w1_oihw, w2_oihw, g1, b1, g2, b2):
    """x_nchw: (N, C, H, W) f32; w*_oihw: (Cout, Cin, 3, 3) f32 (PyTorch layout)."""
    N, Cin, H, W = x_nchw.shape
    Cout = w1_oihw.shape[0]
    assert Cin == Cout, "residual path requires in_channels == out_channels (downsample=None)"
    WC = W * Cout

    # glue: NCHW -> lane-dense (N, H, W*C)
    x_f = jnp.transpose(x_nchw, (0, 2, 3, 1)).reshape(N, H, W * Cin).astype(jnp.float32)

    # glue: weights -> banded matmul layout (built once, outside the kernel)
    w1b = _banded_weight(w1_oihw, W)    # (3*W*Cin, W*Cout)
    w2b = _banded_weight(w2_oihw, W)    # (3*W*Cout, W*Cout)

    # one-hot helpers for BN lane-group<->channel mapping
    eye = jnp.eye(Cout, dtype=jnp.float32)
    gmat = jnp.tile(eye, (W, 1))        # (W*Cout, Cout)
    gspread = jnp.tile(eye, (1, W))     # (Cout, W*Cout)

    g1_ = g1.reshape(1, Cout).astype(jnp.float32)
    b1_ = b1.reshape(1, Cout).astype(jnp.float32)
    g2_ = g2.reshape(1, Cout).astype(jnp.float32)
    b2_ = b2.reshape(1, Cout).astype(jnp.float32)

    # For larger shapes: tile over a grid and/or raise
    # pltpu.CompilerParams(vmem_limit_bytes=...); this toy size fits the default
    # scoped VMEM on all generations.
    out_f = pl.pallas_call(
        _resblock_kernel,
        out_shape=jax.ShapeDtypeStruct((N, H, WC), jnp.float32),
        in_specs=[pl.BlockSpec(memory_space=pltpu.MemorySpace.VMEM)] * 9,
        out_specs=pl.BlockSpec(memory_space=pltpu.MemorySpace.VMEM),
    )(x_f, w1b, w2b, g1_, b1_, g2_, b2_, gmat, gspread)

    out_nhwc = out_f.reshape(N, H, W, Cout)
    return jnp.transpose(out_nhwc, (0, 3, 1, 2))  # back to NCHW


def _reference_forward(x, w1, w2, g1, b1, g2, b2):
    """Pure-JAX reference of the PyTorch forward (training-mode BN)."""
    def conv(x, w):
        return jax.lax.conv_general_dilated(
            x, w, window_strides=(1, 1), padding=((1, 1), (1, 1)),
            dimension_numbers=('NCHW', 'OIHW', 'NCHW'))

    def bn(x, g, b):
        mean = x.mean(axis=(0, 2, 3), keepdims=True)
        var = ((x - mean) ** 2).mean(axis=(0, 2, 3), keepdims=True)
        return ((x - mean) * jax.lax.rsqrt(var + EPS)
                * g.reshape(1, -1, 1, 1) + b.reshape(1, -1, 1, 1))

    out = jax.nn.relu(bn(conv(x, w1), g1, b1))
    out = bn(conv(out, w2), g2, b2)
    return jax.nn.relu(out + x)


if __name__ == "__main__":
    key = jax.random.PRNGKey(0)
    ks = jax.random.split(key, 7)
    N, C, H, W = 2, 8, 16, 16   # in_channels == out_channels, stride=1, downsample=None

    x = jax.random.normal(ks[0], (N, C, H, W), jnp.float32)
    w1 = 0.1 * jax.random.normal(ks[1], (C, C, 3, 3), jnp.float32)
    w2 = 0.1 * jax.random.normal(ks[2], (C, C, 3, 3), jnp.float32)
    g1 = 1.0 + 0.1 * jax.random.normal(ks[3], (C,), jnp.float32)
    b1 = 0.1 * jax.random.normal(ks[4], (C,), jnp.float32)
    g2 = 1.0 + 0.1 * jax.random.normal(ks[5], (C,), jnp.float32)
    b2 = 0.1 * jax.random.normal(ks[6], (C,), jnp.float32)

    out = residual_block_forward(x, w1, w2, g1, b1, g2, b2)
    out = jax.block_until_ready(out)

    ref = _reference_forward(x, w1, w2, g1, b1, g2, b2)
    assert out.shape == (N, C, H, W)
    err = float(jnp.max(jnp.abs(out - ref)))
    assert jnp.allclose(out, ref, atol=2e-3, rtol=2e-3), f"max abs err = {err}"

    print("KERNEL_OK")
</pallas_src>

<mosaic_0001>
module attributes {stable_mosaic.version = 11 : i64} {
  func.func @_resblock_kernel(%arg0: memref<2x16x128xf32, #tpu.memory_space<vmem>>, %arg1: memref<384x128xf32, #tpu.memory_space<vmem>>, %arg2: memref<384x128xf32, #tpu.memory_space<vmem>>, %arg3: memref<1x8xf32, #tpu.memory_space<vmem>>, %arg4: memref<1x8xf32, #tpu.memory_space<vmem>>, %arg5: memref<1x8xf32, #tpu.memory_space<vmem>>, %arg6: memref<1x8xf32, #tpu.memory_space<vmem>>, %arg7: memref<128x8xf32, #tpu.memory_space<vmem>>, %arg8: memref<8x128xf32, #tpu.memory_space<vmem>>, %arg9: memref<2x16x128xf32, #tpu.memory_space<vmem>>) attributes {dimension_semantics = [], scalar_prefetch = 0 : i64, scratch_operands = 0 : i64, tpu.core_type = #tpu.core_type<tc>} {
    %c0 = arith.constant 0 : index
    %c0_0 = arith.constant 0 : index
    %c0_1 = arith.constant 0 : index
    %0 = vector.load %arg0[%c0, %c0_0, %c0_1] : memref<2x16x128xf32, #tpu.memory_space<vmem>>, vector<2x16x128xf32>
    %c0_2 = arith.constant 0 : index
    %c0_3 = arith.constant 0 : index
    %1 = vector.load %arg7[%c0_2, %c0_3] : memref<128x8xf32, #tpu.memory_space<vmem>>, vector<128x8xf32>
    %c0_4 = arith.constant 0 : index
    %c0_5 = arith.constant 0 : index
    %2 = vector.load %arg8[%c0_4, %c0_5] : memref<8x128xf32, #tpu.memory_space<vmem>>, vector<8x128xf32>
    %cst = arith.constant 0.000000e+00 : f32
    %3 = vector.broadcast %cst : f32 to vector<2x1x128xf32>
    %4 = vector.extract_strided_slice %0 {offsets = [0, 0, 0], sizes = [2, 15, 128], strides = [1, 1, 1]} : vector<2x16x128xf32> to vector<2x15x128xf32>
    %5 = tpu.concatenate %3, %4 in 1 : vector<2x1x128xf32>, vector<2x15x128xf32> -> vector<2x16x128xf32>
    %6 = vector.extract_strided_slice %0 {offsets = [0, 1, 0], sizes = [2, 15, 128], strides = [1, 1, 1]} : vector<2x16x128xf32> to vector<2x15x128xf32>
    %7 = tpu.concatenate %6, %3 in 1 : vector<2x15x128xf32>, vector<2x1x128xf32> -> vector<2x16x128xf32>
    %8 = tpu.concatenate %5, %0, %7 in 2 : vector<2x16x128xf32>, vector<2x16x128xf32>, vector<2x16x128xf32> -> vector<2x16x384xf32>
    %9 = vector.shape_cast %8 : vector<2x16x384xf32> to vector<32x384xf32>
    %c0_6 = arith.constant 0 : index
    %c0_7 = arith.constant 0 : index
    %10 = vector.load %arg1[%c0_6, %c0_7] : memref<384x128xf32, #tpu.memory_space<vmem>>, vector<384x128xf32>
    %cst_8 = arith.constant dense<0.000000e+00> : vector<32x128xf32>
    %11 = tpu.matmul %9, %10, %cst_8 {dimension_numbers = #tpu.dot_dimension_numbers<[1], [0], [0], [1], [0, 0, 1, 1], [], []>} : vector<32x384xf32>, vector<384x128xf32>, vector<32x128xf32> -> vector<32x128xf32>
    %c0_9 = arith.constant 0 : index
    %c0_10 = arith.constant 0 : index
    %12 = vector.load %arg3[%c0_9, %c0_10] : memref<1x8xf32, #tpu.memory_space<vmem>>, vector<1x8xf32>
    %c0_11 = arith.constant 0 : index
    %c0_12 = arith.constant 0 : index
    %13 = vector.load %arg4[%c0_11, %c0_12] : memref<1x8xf32, #tpu.memory_space<vmem>>, vector<1x8xf32>
    %cst_13 = arith.constant dense<0.000000e+00> : vector<128xf32>
    %14 = vector.multi_reduction <add>, %11, %cst_13 [0] : vector<32x128xf32> to vector<128xf32>
    %15 = vector.shape_cast %14 : vector<128xf32> to vector<1x128xf32>
    %16 = arith.mulf %11, %11 : vector<32x128xf32>
    %cst_14 = arith.constant dense<0.000000e+00> : vector<128xf32>
    %17 = vector.multi_reduction <add>, %16, %cst_14 [0] : vector<32x128xf32> to vector<128xf32>
    %18 = vector.shape_cast %17 : vector<128xf32> to vector<1x128xf32>
    %cst_15 = arith.constant dense<0.000000e+00> : vector<1x8xf32>
    %19 = tpu.matmul %15, %1, %cst_15 {dimension_numbers = #tpu.dot_dimension_numbers<[1], [0], [0], [1], [0, 0, 1, 1], [], []>} : vector<1x128xf32>, vector<128x8xf32>, vector<1x8xf32> -> vector<1x8xf32>
    %cst_16 = arith.constant dense<0.000000e+00> : vector<1x8xf32>
    %20 = tpu.matmul %18, %1, %cst_16 {dimension_numbers = #tpu.dot_dimension_numbers<[1], [0], [0], [1], [0, 0, 1, 1], [], []>} : vector<1x128xf32>, vector<128x8xf32>, vector<1x8xf32> -> vector<1x8xf32>
    %cst_17 = arith.constant 0.001953125 : f32
    %21 = vector.broadcast %cst_17 : f32 to vector<1x8xf32>
    %22 = arith.mulf %19, %21 : vector<1x8xf32>
    %cst_18 = arith.constant 0.001953125 : f32
    %23 = vector.broadcast %cst_18 : f32 to vector<1x8xf32>
    %24 = arith.mulf %20, %23 : vector<1x8xf32>
    %25 = arith.mulf %22, %22 : vector<1x8xf32>
    %26 = arith.subf %24, %25 : vector<1x8xf32>
    %cst_19 = arith.constant 9.99999974E-6 : f32
    %27 = vector.broadcast %cst_19 : f32 to vector<1x8xf32>
    %28 = arith.addf %26, %27 : vector<1x8xf32>
    %29 = math.rsqrt %28 : vector<1x8xf32>
    %30 = arith.mulf %29, %12 : vector<1x8xf32>
    %31 = arith.mulf %22, %30 : vector<1x8xf32>
    %32 = arith.subf %13, %31 : vector<1x8xf32>
    %cst_20 = arith.constant dense<0.000000e+00> : vector<1x128xf32>
    %33 = tpu.matmul %30, %2, %cst_20 {dimension_numbers = #tpu.dot_dimension_numbers<[1], [0], [0], [1], [0, 0, 1, 1], [], []>} : vector<1x8xf32>, vector<8x128xf32>, vector<1x128xf32> -> vector<1x128xf32>
    %cst_21 = arith.constant dense<0.000000e+00> : vector<1x128xf32>
    %34 = tpu.matmul %32, %2, %cst_21 {dimension_numbers = #tpu.dot_dimension_numbers<[1], [0], [0], [1], [0, 0, 1, 1], [], []>} : vector<1x8xf32>, vector<8x128xf32>, vector<1x128xf32> -> vector<1x128xf32>
    %35 = vector.broadcast %33 : vector<1x128xf32> to vector<32x128xf32>
    %36 = arith.mulf %11, %35 : vector<32x128xf32>
    %37 = vector.broadcast %34 : vector<1x128xf32> to vector<32x128xf32>
    %38 = arith.addf %36, %37 : vector<32x128xf32>
    %cst_22 = arith.constant 0.000000e+00 : f32
    %39 = vector.broadcast %cst_22 : f32 to vector<32x128xf32>
    %40 = arith.maximumf %38, %39 : vector<32x128xf32>
    %41 = vector.shape_cast %40 : vector<32x128xf32> to vector<2x16x128xf32>
    %cst_23 = arith.constant 0.000000e+00 : f32
    %42 = vector.broadcast %cst_23 : f32 to vector<2x1x128xf32>
    %43 = vector.extract_strided_slice %41 {offsets = [0, 0, 0], sizes = [2, 15, 128], strides = [1, 1, 1]} : vector<2x16x128xf32> to vector<2x15x128xf32>
    %44 = tpu.concatenate %42, %43 in 1 : vector<2x1x128xf32>, vector<2x15x128xf32> -> vector<2x16x128xf32>
    %45 = vector.extract_strided_slice %41 {offsets = [0, 1, 0], sizes = [2, 15, 128], strides = [1, 1, 1]} : vector<2x16x128xf32> to vector<2x15x128xf32>
    %46 = tpu.concatenate %45, %42 in 1 : vector<2x15x128xf32>, vector<2x1x128xf32> -> vector<2x16x128xf32>
    %47 = tpu.concatenate %44, %41, %46 in 2 : vector<2x16x128xf32>, vector<2x16x128xf32>, vector<2x16x128xf32> -> vector<2x16x384xf32>
    %48 = vector.shape_cast %47 : vector<2x16x384xf32> to vector<32x384xf32>
    %c0_24 = arith.constant 0 : index
    %c0_25 = arith.constant 0 : index
    %49 = vector.load %arg2[%c0_24, %c0_25] : memref<384x128xf32, #tpu.memory_space<vmem>>, vector<384x128xf32>
    %cst_26 = arith.constant dense<0.000000e+00> : vector<32x128xf32>
    %50 = tpu.matmul %48, %49, %cst_26 {dimension_numbers = #tpu.dot_dimension_numbers<[1], [0], [0], [1], [0, 0, 1, 1], [], []>} : vector<32x384xf32>, vector<384x128xf32>, vector<32x128xf32> -> vector<32x128xf32>
    %c0_27 = arith.constant 0 : index
    %c0_28 = arith.constant 0 : index
    %51 = vector.load %arg5[%c0_27, %c0_28] : memref<1x8xf32, #tpu.memory_space<vmem>>, vector<1x8xf32>
    %c0_29 = arith.constant 0 : index
    %c0_30 = arith.constant 0 : index
    %52 = vector.load %arg6[%c0_29, %c0_30] : memref<1x8xf32, #tpu.memory_space<vmem>>, vector<1x8xf32>
    %cst_31 = arith.constant dense<0.000000e+00> : vector<128xf32>
    %53 = vector.multi_reduction <add>, %50, %cst_31 [0] : vector<32x128xf32> to vector<128xf32>
    %54 = vector.shape_cast %53 : vector<128xf32> to vector<1x128xf32>
    %55 = arith.mulf %50, %50 : vector<32x128xf32>
    %cst_32 = arith.constant dense<0.000000e+00> : vector<128xf32>
    %56 = vector.multi_reduction <add>, %55, %cst_32 [0] : vector<32x128xf32> to vector<128xf32>
    %57 = vector.shape_cast %56 : vector<128xf32> to vector<1x128xf32>
    %cst_33 = arith.constant dense<0.000000e+00> : vector<1x8xf32>
    %58 = tpu.matmul %54, %1, %cst_33 {dimension_numbers = #tpu.dot_dimension_numbers<[1], [0], [0], [1], [0, 0, 1, 1], [], []>} : vector<1x128xf32>, vector<128x8xf32>, vector<1x8xf32> -> vector<1x8xf32>
    %cst_34 = arith.constant dense<0.000000e+00> : vector<1x8xf32>
    %59 = tpu.matmul %57, %1, %cst_34 {dimension_numbers = #tpu.dot_dimension_numbers<[1], [0], [0], [1], [0, 0, 1, 1], [], []>} : vector<1x128xf32>, vector<128x8xf32>, vector<1x8xf32> -> vector<1x8xf32>
    %cst_35 = arith.constant 0.001953125 : f32
    %60 = vector.broadcast %cst_35 : f32 to vector<1x8xf32>
    %61 = arith.mulf %58, %60 : vector<1x8xf32>
    %cst_36 = arith.constant 0.001953125 : f32
    %62 = vector.broadcast %cst_36 : f32 to vector<1x8xf32>
    %63 = arith.mulf %59, %62 : vector<1x8xf32>
    %64 = arith.mulf %61, %61 : vector<1x8xf32>
    %65 = arith.subf %63, %64 : vector<1x8xf32>
    %cst_37 = arith.constant 9.99999974E-6 : f32
    %66 = vector.broadcast %cst_37 : f32 to vector<1x8xf32>
    %67 = arith.addf %65, %66 : vector<1x8xf32>
    %68 = math.rsqrt %67 : vector<1x8xf32>
    %69 = arith.mulf %68, %51 : vector<1x8xf32>
    %70 = arith.mulf %61, %69 : vector<1x8xf32>
    %71 = arith.subf %52, %70 : vector<1x8xf32>
    %cst_38 = arith.constant dense<0.000000e+00> : vector<1x128xf32>
    %72 = tpu.matmul %69, %2, %cst_38 {dimension_numbers = #tpu.dot_dimension_numbers<[1], [0], [0], [1], [0, 0, 1, 1], [], []>} : vector<1x8xf32>, vector<8x128xf32>, vector<1x128xf32> -> vector<1x128xf32>
    %cst_39 = arith.constant dense<0.000000e+00> : vector<1x128xf32>
    %73 = tpu.matmul %71, %2, %cst_39 {dimension_numbers = #tpu.dot_dimension_numbers<[1], [0], [0], [1], [0, 0, 1, 1], [], []>} : vector<1x8xf32>, vector<8x128xf32>, vector<1x128xf32> -> vector<1x128xf32>
    %74 = vector.broadcast %72 : vector<1x128xf32> to vector<32x128xf32>
    %75 = arith.mulf %50, %74 : vector<32x128xf32>
    %76 = vector.broadcast %73 : vector<1x128xf32> to vector<32x128xf32>
    %77 = arith.addf %75, %76 : vector<32x128xf32>
    %78 = vector.shape_cast %0 : vector<2x16x128xf32> to vector<32x128xf32>
    %79 = arith.addf %77, %78 : vector<32x128xf32>
    %cst_40 = arith.constant 0.000000e+00 : f32
    %80 = vector.broadcast %cst_40 : f32 to vector<32x128xf32>
    %81 = arith.maximumf %79, %80 : vector<32x128xf32>
    %82 = vector.shape_cast %81 : vector<32x128xf32> to vector<2x16x128xf32>
    %c0_41 = arith.constant 0 : index
    %c0_42 = arith.constant 0 : index
    %c0_43 = arith.constant 0 : index
    %83 = vector.load %arg9[%c0_41, %c0_42, %c0_43] : memref<2x16x128xf32, #tpu.memory_space<vmem>>, vector<2x16x128xf32>
    tpu.vector_store %arg9[%c0_41, %c0_42, %c0_43], %82 {strides = array<i32>} : memref<2x16x128xf32, #tpu.memory_space<vmem>>, vector<2x16x128xf32>,
    return
  }
}

</mosaic_0001>

<bundles_post_ra>
// kernel: tpu_custom_call.1
= control target key start
LH: loop header
LB: loop body
LE: loop exit
PB: predicated region body
PF: predicated region fallthrough
CT: control target
= control target key end

     0   :  { %14 = vsyncpa [#allocation3], 0  ;;  %s2418_s0 = inlined_call_operand.vmem [shape: f32[2,16,128], index: 0, kind: input, shape index: {}]   ;;  %s2419_s1 = inlined_call_operand.hbm [shape: f32[384,128], index: 1, kind: input, shape index: {}]   ;;  %s2420_s2 = inlined_call_operand.hbm [shape: f32[384,128], index: 2, kind: input, shape index: {}]   ;;  %s2421_s3 = inlined_call_operand.vmem [shape: f32[1,8], index: 3, kind: input, shape index: {}]   ;;  %s2422_s4 = inlined_call_operand.vmem [shape: f32[1,8], index: 4, kind: input, shape index: {}]   ;;  %s2423_s5 = inlined_call_operand.vmem [shape: f32[1,8], index: 5, kind: input, shape index: {}]   ;;  %s2424_s6 = inlined_call_operand.vmem [shape: f32[1,8], index: 6, kind: input, shape index: {}]   ;;  %s2425_s7 = inlined_call_operand.vmem [shape: f32[128,8], index: 7, kind: input, shape index: {}]   ;;  %s2426_s8 = inlined_call_operand.vmem [shape: f32[8,128], index: 8, kind: input, shape index: {}]   ;;  %s2427_s9 = inlined_call_operand.hbm [shape: f32[2,16,128], index: 9, kind: output, shape index: {}]  }
   0x1   :  { %15 = vsyncpa [#allocation6], 0 }
   0x2   :  { %16 = vsyncpa [#allocation4], 0  ;;  %s2045_s30 = smov [#allocation2]   ;;  %s1973_s13 = scalar_lea.hbm %s2419_s1, 6144 }
   0x3   :  { %s24_s10 = sshll.u32 %s2045_s30, 4  ;;  %p1974_p0 = scmp.ne.s32.totalorder %s2419_s1, %s1973_s13  ;;  %s25_s10 = int_to_ptr.vmem [resolvable:$true] %s24_s10 }
   0x4   :  { %p1977_p1 = scmp.lt.u32.totalorder %s1973_s13, %s2419_s1 }
   0x6   :  { %p1979_p2 = pnand %p1977_p1, %p1974_p0 }
   0x8   :  { %1982 = shalt.err (!%p1979_p2)
}
   0x9   :  { %s1983_s18 = scalar_lea.vmem %s25_s10, 6144  ;;  %p1988_p4 = scmp.lt.s32.totalorder %s25_s10, %s25_s10 }
   0xa   :  { %p1984_p3 = scmp.ne.s32.totalorder %s25_s10, %s1983_s18  ;;  %p1989_p5 = scmp.lt.s32.totalorder %s1983_s18, %s1983_s18 }
   0xc   :  { %p1990_p6 = por %p1989_p5, %p1988_p4 }
   0xe   :  { %p1991_p7 = pnand %p1990_p6, %p1984_p3 }
  0x10   :  { %1994 = shalt.err (!%p1991_p7)
}
  0x11   :  { %s2046_s19 = smov 128   ;;  %s2047_s20 = smov 8  }
  0x12   :  { %30 = dma.hbm_to_vmem [thread:$0]  %s2419_s1, 6144, %s25_s10, [#allocation3], %s2046_s19, %s2046_s19, %s2047_s20  }
  0x13   :  { %s2048_s23 = smov [#allocation5]   ;;  %s1995_s27 = scalar_lea.hbm %s2420_s2, 6144 }
  0x14   :  { %s36_s24 = sshll.u32 %s2048_s23, 4  ;;  %p1996_p8 = scmp.ne.s32.totalorder %s2420_s2, %s1995_s27  ;;  %s37_s24 = int_to_ptr.vmem [resolvable:$true] %s36_s24 }
  0x15   :  { %p1999_p9 = scmp.lt.u32.totalorder %s1995_s27, %s2420_s2 }
  0x17   :  { %p2001_p10 = pnand %p1999_p9, %p1996_p8 }
  0x19   :  { %2004 = shalt.err (!%p2001_p10)
}
  0x1a   :  { %s2005_s12 = scalar_lea.vmem %s37_s24, 6144  ;;  %p2010_p12 = scmp.lt.s32.totalorder %s37_s24, %s37_s24 }
  0x1b   :  { %p2006_p11 = scmp.ne.s32.totalorder %s37_s24, %s2005_s12  ;;  %p2011_p13 = scmp.lt.s32.totalorder %s2005_s12, %s2005_s12 }
  0x1d   :  { %p2012_p0 = por %p2011_p13, %p2010_p12 }
  0x1f   :  { %p2013_p1 = pnand %p2012_p0, %p2006_p11 }
  0x21   :  { %2016 = shalt.err (!%p2013_p1)
}
  0x22   :  { %42 = dma.hbm_to_vmem [thread:$0]  %s2420_s2, 6144, %s37_s24, [#allocation6], %s2046_s19, %s2046_s19, %s2047_s20  }
  0x23   :  { %2039 = dma.done.wait [#allocation3], 6144  }
  0x24   :  { %2040 = vsyncadd [#allocation3], 4294961152 }
  0x25   :  { %2041 = dma.done.wait [#allocation6], 6144  }
  0x26   :  { %2042 = vsyncadd [#allocation6], 4294961152  ;;  %v128_v0 = vld [vmem:[#allocation2 + $0x80] sm:$0xff]  ;;  %v129_v1 = vld [vmem:[#allocation2 + $0x88] sm:$0xff]  ;;  %vm99_vm0 = vcmask 1046528   ;;  %vm86_vm1 = vcmask 1040384  }
  0x27   :  { %v112_v2 = vld [vmem:[#allocation2] sm:$0xff]  ;;  %v1737_v3 = vpack.c.bf16 %v129_v1, %v128_v0  ;;  %v113_v4 = vld [vmem:[#allocation2 + $0x8] sm:$0xff]  ;;  %v130_v9 = vld [vmem:[#allocation2 + $0x90] sm:$0xff]  ;;  %vm2050_vm3 = vmmov 0   ;;  %vm503_vm4 = vcmask 64512  }
  0x28   :  { %v144_v5 = vld [vmem:[#allocation2 + $0x100] sm:$0xff]  ;;  %v145_v6 = vld [vmem:[#allocation2 + $0x108] sm:$0xff]  ;;  %v1739_v7 = vpack.c.bf16 %v113_v4, %v112_v2  ;;  %v131_v10 = vld [vmem:[#allocation2 + $0x98] sm:$0xff] }
  0x29   :  { %v1769_v8 = vpack.c.bf16 %v145_v6, %v144_v5  ;;  %v114_v11 = vld [vmem:[#allocation2 + $0x10] sm:$0xff]  ;;  %1738 = vmatprep.subr.bf16.mxu0 %v1737_v3  ;;  %v1741_v12 = vpack.c.bf16 %v131_v10, %v130_v9  ;;  %v115_v13 = vld [vmem:[#allocation2 + $0x18] sm:$0xff]  ;;  %v132_v18 = vld [vmem:[#allocation2 + $0xa0] sm:$0xff] }
  0x2a   :  { %v146_v14 = vld [vmem:[#allocation2 + $0x110] sm:$0xff]  ;;  %v147_v15 = vld [vmem:[#allocation2 + $0x118] sm:$0xff]  ;;  %1740 = vmatpush3.bf16.msra.mxu0 %v1739_v7  ;;  %v1743_v16 = vpack.c.bf16 %v115_v13, %v114_v11  ;;  %v133_v19 = vld [vmem:[#allocation2 + $0xa8] sm:$0xff] }
  0x2b   :  { %1770 = vmatprep.subr.bf16.mxu1 %v1769_v8  ;;  %v1773_v17 = vpack.c.bf16 %v147_v15, %v146_v14  ;;  %v116_v20 = vld [vmem:[#allocation2 + $0x20] sm:$0xff]  ;;  %1742 = vmatprep.subr.bf16.mxu0 %v1741_v12  ;;  %v1745_v21 = vpack.c.bf16 %v133_v19, %v132_v18  ;;  %v117_v22 = vld [vmem:[#allocation2 + $0x28] sm:$0xff]  ;;  %v134_v26 = vld [vmem:[#allocation2 + $0xb0] sm:$0xff] }
  0x2c   :  { %1772 = vmatpush3.bf16.msra.mxu1 %v1769_v8  ;;  %v148_v23 = vld [vmem:[#allocation2 + $0x120] sm:$0xff]  ;;  %v149_v24 = vld [vmem:[#allocation2 + $0x128] sm:$0xff]  ;;  %v135_v27 = vld [vmem:[#allocation2 + $0xb8] sm:$0xff]  ;;  %v1747_v30 = vpack.c.bf16 %v117_v22, %v116_v20 }
  0x2d   :  { %1774 = vmatprep.subr.bf16.mxu1 %v1773_v17  ;;  %v1777_v25 = vpack.c.bf16 %v149_v24, %v148_v23  ;;  %v150_v28 = vld [vmem:[#allocation2 + $0x130] sm:$0xff]  ;;  %v151_v29 = vld [vmem:[#allocation2 + $0x138] sm:$0xff]  ;;  %v1749_v31 = vpack.c.bf16 %v135_v27, %v134_v26  ;;  %v136_v35 = vld [vmem:[#allocation2 + $0xc0] sm:$0xff] }
  0x2e   :  { %1744 = vmatpush3.bf16.msra.mxu0 %v1743_v16  ;;  %v118_v32 = vld [vmem:[#allocation2 + $0x30] sm:$0xff]  ;;  %v119_v33 = vld [vmem:[#allocation2 + $0x38] sm:$0xff]  ;;  %v1781_v34 = vpack.c.bf16 %v151_v29, %v150_v28  ;;  %v137_v36 = vld [vmem:[#allocation2 + $0xc8] sm:$0xff]  ;;  %v2049_v28 = vmov 0.0|0.0  }
  0x2f   :  { %1746 = vmatprep.subr.bf16.mxu0 %v1745_v21  ;;  %v152_v37 = vld [vmem:[#allocation2 + $0x140] sm:$0xff]  ;;  %v153_v38 = vld [vmem:[#allocation2 + $0x148] sm:$0xff]  ;;  %v1751_v39 = vpack.c.bf16 %v119_v33, %v118_v32  ;;  %v1753_v40 = vpack.c.bf16 %v137_v36, %v136_v35  ;;  %v138_v44 = vld [vmem:[#allocation2 + $0xd0] sm:$0xff] }
  0x30   :  { %1776 = vmatpush3.bf16.msra.mxu1 %v1773_v17  ;;  %v120_v41 = vld [vmem:[#allocation2 + $0x40] sm:$0xff]  ;;  %v121_v42 = vld [vmem:[#allocation2 + $0x48] sm:$0xff]  ;;  %v1785_v43 = vpack.c.bf16 %v153_v38, %v152_v37  ;;  %v139_v45 = vld [vmem:[#allocation2 + $0xd8] sm:$0xff] }
  0x31   :  { %1778 = vmatprep.subr.bf16.mxu1 %v1777_v25  ;;  %v154_v46 = vld [vmem:[#allocation2 + $0x150] sm:$0xff]  ;;  %v155_v47 = vld [vmem:[#allocation2 + $0x158] sm:$0xff]  ;;  %v1755_v48 = vpack.c.bf16 %v121_v42, %v120_v41  ;;  %v2136_v49 = vld [vmem:[%s2418_s0] sm:$0xff]  ;;  %v1757_v51 = vpack.c.bf16 %v139_v45, %v138_v44 }
  0x32   :  { %1748 = vmatpush3.bf16.msra.mxu0 %v1747_v30  ;;  %v2141_v50 = vld [vmem:[%s2418_s0 + $0x8] sm:$0xff]  ;;  %v122_v52 = vld [vmem:[#allocation2 + $0x50] sm:$0xff]  ;;  %v123_v53 = vld [vmem:[#allocation2 + $0x58] sm:$0xff]  ;;  %v100_v54 = vrot.slane %v2136_v49, 1  ;;  %v1789_v56 = vpack.c.bf16 %v155_v47, %v154_v46  ;;  %224 = vmatprep.mubr.f32.mxu0 %v2136_v49  ;;  %v87_v17 = vrot.slane %v2136_v49, 7 }
  0x33   :  { %1750 = vmatprep.subr.bf16.mxu0 %v1749_v31  ;;  %v101_v55 = vrot.slane %v2141_v50, 1  ;;  %v140_v57 = vld [vmem:[#allocation2 + $0xe0] sm:$0xff]  ;;  %v141_v58 = vld [vmem:[#allocation2 + $0xe8] sm:$0xff]  ;;  %v1759_v62 = vpack.c.bf16 %v123_v53, %v122_v52  ;;  %v142_v3 = vld [vmem:[#allocation2 + $0xf0] sm:$0xff]  ;;  %v88_v19 = vrot.slane %v2141_v50, 7  ;;  %v2051_v52 = vmov 0.0  }
  0x34   :  { %1780 = vmatpush3.bf16.msra.mxu1 %v1777_v25  ;;  %v156_v59 = vld [vmem:[#allocation2 + $0x160] sm:$0xff]  ;;  %v157_v60 = vld [vmem:[#allocation2 + $0x168] sm:$0xff]  ;;  %v1761_v63 = vpack.c.bf16 %v141_v58, %v140_v57  ;;  %v143_v4 = vld [vmem:[#allocation2 + $0xf8] sm:$0xff] }
  0x35   :  { %1782 = vmatprep.subr.bf16.mxu1 %v1781_v34  ;;  %v102_v61 = vsel %vm99_vm0, %v100_v54, %v101_v55  ;;  %v124_v0 = vld [vmem:[#allocation2 + $0x60] sm:$0xff]  ;;  %v125_v1 = vld [vmem:[#allocation2 + $0x68] sm:$0xff]  ;;  %v1793_v2 = vpack.c.bf16 %v157_v60, %v156_v59  ;;  %v158_v5 = vld [vmem:[#allocation2 + $0x170] sm:$0xff]  ;;  %v1765_v8 = vpack.c.bf16 %v143_v4, %v142_v3  ;;  %v89_v21 = vsel %vm86_vm1, %v87_v17, %v88_v19 }
  0x36   :  { %1752 = vmatpush3.bf16.msra.mxu0 %v1751_v39  ;;  %1533 = vmatprep.mubr.f32.mxu1 %v102_v61  ;;  %v159_v6 = vld [vmem:[#allocation2 + $0x178] sm:$0xff]  ;;  %v1763_v7 = vpack.c.bf16 %v125_v1, %v124_v0  ;;  %v126_v9 = vld [vmem:[#allocation2 + $0x70] sm:$0xff]  ;;  %vm2161_vm2 = vmneg %vm86_vm1 }
  0x37   :  { %1754 = vmatprep.subr.bf16.mxu0 %v1753_v40  ;;  %v127_v10 = vld [vmem:[#allocation2 + $0x78] sm:$0xff]  ;;  %v1797_v11 = vpack.c.bf16 %v159_v6, %v158_v5  ;;  %v2150_v12 = vld [vmem:[%s2418_s0 + $0x10] sm:$0xff]  ;;  %v65_v25 = vld [vmem:[%s2425_s7] sm:$0xff] }
  0x38   :  { %1784 = vmatpush3.bf16.msra.mxu1 %v1781_v34  ;;  %v2155_v13 = vld [vmem:[%s2418_s0 + $0x18] sm:$0xff]  ;;  %v1767_v14 = vpack.c.bf16 %v127_v10, %v126_v9  ;;  %v103_v15 = vrot.slane %v2150_v12, 1  ;;  %v90_v22 = vrot.slane %v2150_v12, 7  ;;  %v66_v26 = vld [vmem:[%s2425_s7 + $0x8] sm:$0xff]  ;;  %v67_v29 = vld [vmem:[%s2425_s7 + $0x10] sm:$0xff] }
  0x39   :  { %1786 = vmatprep.subr.bf16.mxu1 %v1785_v43  ;;  %v104_v16 = vrot.slane %v2155_v13, 1  ;;  %v91_v23 = vrot.slane %v2155_v13, 7  ;;  %v2186_v27 = vpack.c.bf16 %v66_v26, %v65_v25  ;;  %v68_v30 = vld [vmem:[%s2425_s7 + $0x18] sm:$0xff]  ;;  %v69_v32 = vld [vmem:[%s2425_s7 + $0x20] sm:$0xff]  ;;  %v70_v33 = vld [vmem:[%s2425_s7 + $0x28] sm:$0xff] }
  0x3a   :  { %1756 = vmatpush3.bf16.msra.mxu0 %v1755_v48  ;;  %v2200_v31 = vpack.c.bf16 %v68_v30, %v67_v29  ;;  %v2212_v34 = vpack.c.bf16 %v70_v33, %v69_v32  ;;  %v71_v35 = vld [vmem:[%s2425_s7 + $0x30] sm:$0xff]  ;;  %v72_v36 = vld [vmem:[%s2425_s7 + $0x38] sm:$0xff]  ;;  %v73_v38 = vld [vmem:[%s2425_s7 + $0x40] sm:$0xff] }
  0x3b   :  { %1758 = vmatprep.subr.bf16.mxu0 %v1757_v51  ;;  %v105_v20 = vsel %vm99_vm0, %v103_v15, %v104_v16  ;;  %v92_v24 = vsel %vm86_vm1, %v90_v22, %v91_v23  ;;  %v2224_v37 = vpack.c.bf16 %v72_v36, %v71_v35  ;;  %v74_v39 = vld [vmem:[%s2425_s7 + $0x48] sm:$0xff]  ;;  %v75_v41 = vld [vmem:[%s2425_s7 + $0x50] sm:$0xff]  ;;  %v76_v42 = vld [vmem:[%s2425_s7 + $0x58] sm:$0xff] }
  0x3c   :  { %1788 = vmatpush3.bf16.msra.mxu1 %v1785_v43  ;;  %v2236_v40 = vpack.c.bf16 %v74_v39, %v73_v38  ;;  %v2248_v43 = vpack.c.bf16 %v76_v42, %v75_v41  ;;  %v77_v44 = vld [vmem:[%s2425_s7 + $0x60] sm:$0xff]  ;;  %v78_v45 = vld [vmem:[%s2425_s7 + $0x68] sm:$0xff]  ;;  %v79_v47 = vld [vmem:[%s2425_s7 + $0x70] sm:$0xff] }
  0x3d   :  { %1790 = vmatprep.subr.bf16.mxu1 %v1789_v56  ;;  %v2260_v46 = vpack.c.bf16 %v78_v45, %v77_v44  ;;  %v80_v48 = vld [vmem:[%s2425_s7 + $0x78] sm:$0xff]  ;;  %v2309_v39 = vld [vmem:[%s2426_s8] sm:$0xff]  ;;  %v715_v42 = vld [vmem:[#allocation5 + $0x88] sm:$0xff] }
  0x3e   :  { %1760 = vmatpush3.bf16.msra.mxu0 %v1759_v62  ;;  %v2272_v51 = vpack.c.bf16 %v80_v48, %v79_v47  ;;  %v714_v41 = vld [vmem:[#allocation5 + $0x80] sm:$0xff]  ;;  %v731_v47 = vld [vmem:[#allocation5 + $0x108] sm:$0xff] }
  0x3f   :  { %1762 = vmatprep.subr.bf16.mxu0 %v1761_v63  ;;  %v1849_v44 = vpack.c.bf16 %v715_v42, %v714_v41  ;;  %v730_v45 = vld [vmem:[#allocation5 + $0x100] sm:$0xff]  ;;  %v704_v42 = vld [vmem:[#allocation5 + $0x30] sm:$0xff] }
  0x40   :  { %1792 = vmatpush3.bf16.msra.mxu1 %v1789_v56  ;;  %v1881_v48 = vpack.c.bf16 %v731_v47, %v730_v45  ;;  %v736_v45 = vld [vmem:[#allocation5 + $0x130] sm:$0xff]  ;;  %v737_v47 = vld [vmem:[#allocation5 + $0x138] sm:$0xff] }
  0x41   :  { %1794 = vmatprep.subr.bf16.mxu1 %v1793_v2 }
  0x42   :  { %1764 = vmatpush3.bf16.msra.mxu0 %v1763_v7 }
  0x43   :  { %1766 = vmatprep.subr.bf16.mxu0 %v1765_v8 }
  0x44   :  { %1796 = vmatpush3.bf16.msra.mxu1 %v1793_v2 }
  0x45   :  { %1798 = vmatprep.subr.bf16.mxu1 %v1797_v11 }
  0x46   :  { %1768 = vmatpush3.bf16.msra.mxu0 %v1767_v14 }
  0x47   :  { %1801 = vmatprep.subr.bf16.mxu0 %v2049_v28 }
  0x48   :  { %1800 = vmatpush3.bf16.msra.mxu1 %v1797_v11 }
  0x49   :  { %1282 = vmatmul.mubr.msk.f32.vlgmr.msra.gmra.mrb[0].mxu0 %vm2161_vm2, %v87_v17  ;;  %1825 = vmatprep.subr.bf16.mxu1 %v2049_v28 }
  0x4a   :  { %229 = vmatprep.mubr.f32.mxu0 %v2141_v50  ;;  %1803 = vmatpush3.bf16.msra.mxu0 %v2186_v27 }
  0x4b   :  { %1534 = vmatmul.mubr.msk.f32.vlgmr.msra.gmra.mrb[0].mxu1 %vm99_vm0, %v101_v55  ;;  %1804 = vmatprep.subr.bf16.mxu0 %v2049_v28 }
  0x4c   :  { %1536 = vmatprep.mubr.f32.mxu1 %v105_v20  ;;  %1827 = vmatpush3.bf16.msra.mxu1 %v2186_v27 }
  0x4d   :  { %230 = vmatmul.mubr.f32.gmra.mrb[2].mxu0 %v89_v21  ;;  %1828 = vmatprep.subr.bf16.mxu1 %v2049_v28 }
  0x4e   :  { %234 = vmatprep.mubr.f32.mxu0 %v2150_v12  ;;  %1806 = vmatpush3.bf16.msra.mxu0 %v2200_v31 }
  0x4f   :  { %1537 = vmatmul.mubr.msk.f32.gmra.mrb[2].mxu1 %vm99_vm0, %v104_v16  ;;  %1807 = vmatprep.subr.bf16.mxu0 %v2049_v28 }
  0x50   :  { %1830 = vmatpush3.bf16.msra.mxu1 %v2200_v31  ;;  %1606 = vmatprep.mubr.msk.f32.mxu1 %vm2050_vm3, %v2051_v52 }
  0x51   :  { %1284 = vmatmul.mubr.msk.f32.gmra.mrb[4].mxu0 %vm2161_vm2, %v90_v22  ;;  %1831 = vmatprep.subr.bf16.mxu1 %v2049_v28 }
  0x52   :  { %239 = vmatprep.mubr.f32.mxu0 %v2155_v13  ;;  %1809 = vmatpush3.bf16.msra.mxu0 %v2212_v34 }
  0x53   :  { %1810 = vmatprep.subr.bf16.mxu0 %v2049_v28 }
  0x54   :  { %1833 = vmatpush3.bf16.msra.mxu1 %v2212_v34 }
  0x55   :  { %240 = vmatmul.mubr.f32.gmra.mrb[6].mxu0 %v92_v24  ;;  %1834 = vmatprep.subr.bf16.mxu1 %v2049_v28 }
  0x56   :  { %1812 = vmatpush3.bf16.msra.mxu0 %v2224_v37  ;;  %1571 = vmatprep.mubr.msk.f32.mxu0 %vm2050_vm3, %v2051_v52 }
  0x57   :  { %1813 = vmatprep.subr.bf16.mxu0 %v2049_v28 }
  0x58   :  { %1836 = vmatpush3.bf16.msra.mxu1 %v2224_v37 }
  0x59   :  { %1837 = vmatprep.subr.bf16.mxu1 %v2049_v28 }
  0x5a   :  { %1815 = vmatpush3.bf16.msra.mxu0 %v2236_v40 }
  0x5b   :  { %1816 = vmatprep.subr.bf16.mxu0 %v2049_v28 }
  0x5c   :  { %1839 = vmatpush3.bf16.msra.mxu1 %v2236_v40 }
  0x5d   :  { %1840 = vmatprep.subr.bf16.mxu1 %v2049_v28 }
  0x5e   :  { %1818 = vmatpush3.bf16.msra.mxu0 %v2248_v43 }
  0x5f   :  { %1819 = vmatprep.subr.bf16.mxu0 %v2049_v28 }
  0x60   :  { %1842 = vmatpush3.bf16.msra.mxu1 %v2248_v43 }
  0x61   :  { %1843 = vmatprep.subr.bf16.mxu1 %v2049_v28 }
  0x62   :  { %1821 = vmatpush3.bf16.msra.mxu0 %v2260_v46 }
  0x63   :  { %1822 = vmatprep.subr.bf16.mxu0 %v2049_v28 }
  0x64   :  { %1845 = vmatpush3.bf16.msra.mxu1 %v2260_v46 }
  0x65   :  { %1846 = vmatprep.subr.bf16.mxu1 %v2049_v28 }
  0x66   :  { %1824 = vmatpush3.bf16.msra.mxu0 %v2272_v51 }
  0x67   :  { %1609 = vmatprep.subr.mxu0 %v2051_v52 }
  0x68   :  { %1848 = vmatpush3.bf16.msra.mxu1 %v2272_v51 }
  0x69   :  { %1614 = vmatprep.subr.mxu1 %v2051_v52 }
 0x11c   :  { %v1329_v53 = vpop.f32.mrb[0].mxu0 }
 0x11d   :  { %v1330_v54 = vpop.f32.mrb[1].mxu0 }
 0x11e   :  { %v1535_v55 = vpop.f32.mrb[0].mxu1  ;;  %v1331_v56 = vadd.f32 %v1330_v54, %v1329_v53 }
 0x11f   :  { %v311_v57 = vpop.f32.mrb[1].mxu1 }
 0x120   :  { %v2282_v58 = vadd.f32 %v1331_v56, %v311_v57  ;;  %v1332_v59 = vpop.f32.mrb[2].mxu0 }
 0x121   :  { %v1333_v60 = vpop.f32.mrb[3].mxu0 }
 0x122   :  { %v1538_v61 = vpop.f32.mrb[2].mxu1  ;;  %v1334_v62 = vadd.f32 %v1333_v60, %v1332_v59  ;;  %v341_v8 = vmul.f32 %v2282_v58, %v2282_v58 }
 0x123   :  { %v321_v63 = vpop.f32.mrb[3].mxu1 }
 0x124   :  { %v2284_v0 = vadd.f32 %v1535_v55, %v1334_v62  ;;  %v1335_v1 = vpop.f32.mrb[4].mxu0 }
 0x125   :  { %v1336_v2 = vpop.f32.mrb[5].mxu0 }
 0x126   :  { %v1337_v3 = vadd.f32 %v1336_v2, %v1335_v1  ;;  %v342_v4 = vmul.f32 %v2284_v0, %v2284_v0  ;;  %v332_v9 = vadd.f32 %v2284_v0, %v2282_v58  ;;  %v699_v1 = vld [vmem:[#allocation5 + $0x8] sm:$0xff]  ;;  %v330_v2 = vld [vmem:[%s2421_s3] sm:$0x1] }
 0x128   :  { %v2288_v5 = vadd.f32 %v1337_v3, %v321_v63  ;;  %v1338_v6 = vpop.f32.mrb[6].mxu0  ;;  %v345_v15 = vadd.f32 %v342_v4, %v341_v8  ;;  %v698_v63 = vld [vmem:[#allocation5] sm:$0xff]  ;;  %v716_v3 = vld [vmem:[#allocation5 + $0x90] sm:$0xff]  ;;  %v717_v4 = vld [vmem:[#allocation5 + $0x98] sm:$0xff] }
 0x129   :  { %v1339_v7 = vpop.f32.mrb[7].mxu0  ;;  %v1851_v8 = vpack.c.bf16 %v699_v1, %v698_v63  ;;  %v724_v1 = vld [vmem:[#allocation5 + $0xd0] sm:$0xff] }
 0x12a   :  { %v343_v10 = vmul.f32 %v2288_v5, %v2288_v5  ;;  %v1340_v11 = vadd.f32 %v1339_v7, %v1338_v6  ;;  %v333_v14 = vadd.f32 %v332_v9, %v2288_v5  ;;  %v331_v7 = vld [vmem:[%s2422_s4] sm:$0x1] }
 0x12c   :  { %v2297_v16 = vadd.f32 %v1538_v61, %v1340_v11  ;;  %v346_v17 = vadd.f32 %v345_v15, %v343_v10  ;;  %v1853_v10 = vpack.c.bf16 %v717_v4, %v716_v3  ;;  %v700_v11 = vld [vmem:[#allocation5 + $0x10] sm:$0xff] }
 0x12d   :  { %v732_v15 = vld [vmem:[#allocation5 + $0x110] sm:$0xff] }
 0x12e   :  { %v334_v19 = vadd.f32 %v333_v14, %v2297_v16  ;;  %v344_v20 = vmul.f32 %v2297_v16, %v2297_v16  ;;  %v701_v14 = vld [vmem:[#allocation5 + $0x18] sm:$0xff]  ;;  %v708_v4 = vld [vmem:[#allocation5 + $0x50] sm:$0xff] }
 0x130   :  { %v335_v21 = vrot.slane %v334_v19, 4  ;;  %v347_v22 = vadd.f32 %v346_v17, %v344_v20  ;;  %v733_v17 = vld [vmem:[#allocation5 + $0x118] sm:$0xff]  ;;  %v719_v20 = vld [vmem:[#allocation5 + $0xa8] sm:$0xff] }
 0x132   :  { %v336_v23 = vadd.f32 %v335_v21, %v334_v19  ;;  %v348_v24 = vrot.slane %v347_v22, 4  ;;  %v718_v19 = vld [vmem:[#allocation5 + $0xa0] sm:$0xff] }
 0x134   :  { %v337_v25 = vrot.slane %v336_v23, 2  ;;  %v349_v26 = vadd.f32 %v348_v24, %v347_v22  ;;  %v1855_v22 = vpack.c.bf16 %v701_v14, %v700_v11  ;;  %v1885_v24 = vpack.c.bf16 %v733_v17, %v732_v15  ;;  %v726_v11 = vld [vmem:[#allocation5 + $0xe0] sm:$0xff]  ;;  %v727_v14 = vld [vmem:[#allocation5 + $0xe8] sm:$0xff] }
 0x135   :  { %v1873_v15 = vpack.c.bf16 %v727_v14, %v726_v11  ;;  %v710_v17 = vld [vmem:[#allocation5 + $0x60] sm:$0xff] }
 0x136   :  { %v338_v29 = vadd.f32 %v337_v25, %v336_v23  ;;  %v350_v30 = vrot.slane %v349_v26, 2  ;;  %v1857_v25 = vpack.c.bf16 %v719_v20, %v718_v19  ;;  %v711_v19 = vld [vmem:[#allocation5 + $0x68] sm:$0xff] }
 0x137   :  { %v1875_v20 = vpack.c.bf16 %v711_v19, %v710_v17 }
 0x138   :  { %v339_v32 = vrot.slane %v338_v29, 1  ;;  %v351_v33 = vadd.f32 %v350_v30, %v349_v26  ;;  %v702_v26 = vld [vmem:[#allocation5 + $0x20] sm:$0xff] }
 0x139   :  { %v734_v30 = vld [vmem:[#allocation5 + $0x120] sm:$0xff] }
 0x13a   :  { %v340_v35 = vadd.f32 %v339_v32, %v338_v29  ;;  %v352_v36 = vrot.slane %v351_v33, 1  ;;  %v703_v29 = vld [vmem:[#allocation5 + $0x28] sm:$0xff] }
 0x13b   :  { %v735_v32 = vld [vmem:[#allocation5 + $0x128] sm:$0xff] }
 0x13c   :  { %1572 = vmatmul.mubr.f32.vlgmr.msra.gmra.mrb[8].mxu0 %v340_v35  ;;  %v353_v38 = vadd.f32 %v352_v36, %v351_v33  ;;  %v720_v33 = vld [vmem:[#allocation5 + $0xb0] sm:$0xff]  ;;  %v721_v35 = vld [vmem:[#allocation5 + $0xb8] sm:$0xff]  ;;  %v1859_v36 = vpack.c.bf16 %v703_v29, %v702_v26 }
 0x13d   :  { %1611 = vmatprep.mubr.msk.f32.mxu0 %vm2050_vm3, %v2051_v52  ;;  %1610 = vmatpush3.msra.mxu0 %v2309_v39  ;;  %v1861_v41 = vpack.c.bf16 %v721_v35, %v720_v33  ;;  %v712_v29 = vld [vmem:[#allocation5 + $0x70] sm:$0xff]  ;;  %v745_v35 = vld [vmem:[#allocation5 + $0x178] sm:$0xff] }
 0x13e   :  { %1607 = vmatmul.mubr.f32.vlgmr.msra.gmra.mrb[4].mxu1 %v353_v38  ;;  %1850 = vmatprep.subr.bf16.mxu0 %v1849_v44  ;;  %v1889_v38 = vpack.c.bf16 %v735_v32, %v734_v30  ;;  %v705_v44 = vld [vmem:[#allocation5 + $0x38] sm:$0xff]  ;;  %v744_v33 = vld [vmem:[#allocation5 + $0x170] sm:$0xff] }
 0x13f   :  { %1616 = vmatprep.mubr.msk.f32.mxu1 %vm2050_vm3, %v2051_v52  ;;  %1615 = vmatpush3.msra.mxu1 %v2309_v39  ;;  %v713_v30 = vld [vmem:[#allocation5 + $0x78] sm:$0xff] }
 0x140   :  { %1882 = vmatprep.subr.bf16.mxu1 %v1881_v48  ;;  %v1879_v32 = vpack.c.bf16 %v713_v30, %v712_v29 }
 0x20f   :  { %v420_v53 = vpop.f32.mrb[8].mxu0 }
 0x210   :  { %v494_v54 = vmul.f32 0.001953125, %v420_v53  ;;  %v1573_v55 = vpop.f32.mrb[9].mxu0  ;;  %v722_v53 = vld [vmem:[#allocation5 + $0xc0] sm:$0xff] }
 0x211   :  { %v490_v56 = vpop.f32.mrb[4].mxu1  ;;  %v1863_v55 = vpack.c.bf16 %v705_v44, %v704_v42 }
 0x212   :  { %v496_v57 = vmul.f32 %v494_v54, %v494_v54  ;;  %v495_v59 = vmul.f32 0.001953125, %v490_v56  ;;  %v1608_v60 = vpop.f32.mrb[5].mxu1  ;;  %v1893_v56 = vpack.c.bf16 %v737_v47, %v736_v45 }
 0x213   :  { %v738_v60 = vld [vmem:[#allocation5 + $0x140] sm:$0xff] }
 0x214   :  { %v497_v61 = vsub.f32 %v495_v59, %v496_v57  ;;  %v707_v59 = vld [vmem:[#allocation5 + $0x48] sm:$0xff] }
 0x216   :  { %v498_v62 = vadd.f32 1e-05, %v497_v61  ;;  %v739_v61 = vld [vmem:[#allocation5 + $0x148] sm:$0xff] }
 0x217   :  { %v1897_v63 = vpack.c.bf16 %v739_v61, %v738_v60 }
 0x218   :  { %1969 = vrsqrt.f32 %v498_v62 }
 0x222   :  { %v1970_v6 = vpop.eup %1969 }
 0x223   :  { %v500_v9 = vmul.f32 %v1970_v6, %v330_v2  ;;  %v725_v2 = vld [vmem:[#allocation5 + $0xd8] sm:$0xff] }
 0x224   :  { %v1869_v3 = vpack.c.bf16 %v725_v2, %v724_v1  ;;  %v709_v6 = vld [vmem:[#allocation5 + $0x58] sm:$0xff] }
 0x225   :  { %1612 = vmatmul.mubr.msk.f32.vlgmr.msra.gmra.mrb[10].mxu0 %vm503_vm4, %v500_v9  ;;  %v501_v21 = vmul.f32 %v500_v9, %v494_v54  ;;  %v723_v54 = vld [vmem:[#allocation5 + $0xc8] sm:$0xff]  ;;  %v741_v9 = vld [vmem:[#allocation5 + $0x158] sm:$0xff] }
 0x226   :  { %1852 = vmatpush3.bf16.msra.mxu0 %v1851_v8  ;;  %v1865_v57 = vpack.c.bf16 %v723_v54, %v722_v53  ;;  %v740_v8 = vld [vmem:[#allocation5 + $0x150] sm:$0xff] }
 0x227   :  { %v502_v23 = vsub.f32 %v331_v7, %v501_v21  ;;  %1854 = vmatprep.subr.bf16.mxu0 %v1853_v10  ;;  %v1871_v7 = vpack.c.bf16 %v709_v6, %v708_v4  ;;  %v1901_v10 = vpack.c.bf16 %v741_v9, %v740_v8  ;;  %v742_v21 = vld [vmem:[#allocation5 + $0x160] sm:$0xff] }
 0x229   :  { %1617 = vmatmul.mubr.msk.f32.vlgmr.msra.gmra.mrb[6].mxu1 %vm503_vm4, %v502_v23 }
 0x22a   :  { %1884 = vmatpush3.bf16.msra.mxu1 %v1881_v48  ;;  %1856 = vmatpush3.bf16.msra.mxu0 %v1855_v22  ;;  %v706_v48 = vld [vmem:[#allocation5 + $0x40] sm:$0xff]  ;;  %v743_v22 = vld [vmem:[#allocation5 + $0x168] sm:$0xff] }
 0x22b   :  { %1886 = vmatprep.subr.bf16.mxu1 %v1885_v24  ;;  %1858 = vmatprep.subr.bf16.mxu0 %v1857_v25  ;;  %v1867_v62 = vpack.c.bf16 %v707_v59, %v706_v48  ;;  %v1905_v23 = vpack.c.bf16 %v743_v22, %v742_v21  ;;  %v729_v25 = vld [vmem:[#allocation5 + $0xf8] sm:$0xff] }
 0x22e   :  { %1888 = vmatpush3.bf16.msra.mxu1 %v1885_v24  ;;  %1860 = vmatpush3.bf16.msra.mxu0 %v1859_v36  ;;  %v728_v24 = vld [vmem:[#allocation5 + $0xf0] sm:$0xff]  ;;  %v1909_v36 = vpack.c.bf16 %v745_v35, %v744_v33 }
 0x22f   :  { %1890 = vmatprep.subr.bf16.mxu1 %v1889_v38  ;;  %1862 = vmatprep.subr.bf16.mxu0 %v1861_v41  ;;  %v1877_v26 = vpack.c.bf16 %v729_v25, %v728_v24 }
 0x232   :  { %1892 = vmatpush3.bf16.msra.mxu1 %v1889_v38  ;;  %1864 = vmatpush3.bf16.msra.mxu0 %v1863_v55  ;;  %v650_v38 = vlaneseq }
 0x233   :  { %1894 = vmatprep.subr.bf16.mxu1 %v1893_v56  ;;  %1866 = vmatprep.subr.bf16.mxu0 %v1865_v57 }
 0x234   :  { %v651_v41 = vshrl.u32 %v650_v38, 7 }
 0x236   :  { %1896 = vmatpush3.bf16.msra.mxu1 %v1893_v56  ;;  %1868 = vmatpush3.bf16.msra.mxu0 %v1867_v62  ;;  %v2323_v42 = vsub.s32 0, %v651_v41 }
 0x237   :  { %1898 = vmatprep.subr.bf16.mxu1 %v1897_v63  ;;  %1870 = vmatprep.subr.bf16.mxu0 %v1869_v3 }
 0x23a   :  { %1900 = vmatpush3.bf16.msra.mxu1 %v1897_v63  ;;  %1872 = vmatpush3.bf16.msra.mxu0 %v1871_v7 }
 0x23b   :  { %1902 = vmatprep.subr.bf16.mxu1 %v1901_v10  ;;  %1874 = vmatprep.subr.bf16.mxu0 %v1873_v15 }
 0x23e   :  { %1904 = vmatpush3.bf16.msra.mxu1 %v1901_v10  ;;  %1876 = vmatpush3.bf16.msra.mxu0 %v1875_v20 }
 0x23f   :  { %1906 = vmatprep.subr.bf16.mxu1 %v1905_v23  ;;  %1878 = vmatprep.subr.bf16.mxu0 %v1877_v26 }
 0x242   :  { %1908 = vmatpush3.bf16.msra.mxu1 %v1905_v23  ;;  %1880 = vmatpush3.bf16.msra.mxu0 %v1879_v32 }
 0x243   :  { %1910 = vmatprep.subr.bf16.mxu1 %v1909_v36  ;;  %1913 = vmatprep.subr.bf16.mxu0 %v2049_v28 }
 0x246   :  { %1912 = vmatpush3.bf16.msra.mxu1 %v1909_v36 }
 0x247   :  { %1937 = vmatprep.subr.bf16.mxu1 %v2049_v28 }
 0x2f8   :  { %v573_v44 = vpop.f32.mrb[10].mxu0 }
 0x2f9   :  { %v653_v45 = vrot.slane %v573_v44, %v2323_v42  ;;  %v1613_v47 = vpop.f32.mrb[11].mxu0 }
 0x2fb   :  { %v656_v53 = vmul.f32 %v653_v45, %v2288_v5  ;;  %v657_v55 = vmul.f32 %v653_v45, %v2297_v16  ;;  %v654_v48 = vmul.f32 %v653_v45, %v2282_v58  ;;  %v655_v59 = vmul.f32 %v653_v45, %v2284_v0 }
 0x2fc   :  { %v646_v54 = vpop.f32.mrb[6].mxu1 }
 0x2fd   :  { %v661_v56 = vrot.slane %v646_v54, %v2323_v42  ;;  %v1618_v57 = vpop.f32.mrb[7].mxu1 }
 0x2ff   :  { %v664_v60 = vadd.f32 %v661_v56, %v656_v53  ;;  %v665_v61 = vadd.f32 %v661_v56, %v657_v55  ;;  %v662_v62 = vadd.f32 %v661_v56, %v654_v48  ;;  %v663_v63 = vadd.f32 %v661_v56, %v655_v59 }
 0x301   :  { %v668_v1 = vmax.f32 %v664_v60, 0.0  ;;  %v669_v2 = vmax.f32 %v665_v61, 0.0  ;;  %v666_v3 = vmax.f32 %v662_v62, 0.0  ;;  %v667_v4 = vmax.f32 %v663_v63, 0.0 }
 0x303   :  { %v674_v6 = vrot.slane %v666_v3, 7  ;;  %810 = vmatprep.mubr.f32.mxu0 %v666_v3  ;;  %v686_v5 = vrot.slane %v666_v3, 1  ;;  %v687_v7 = vrot.slane %v667_v4, 1  ;;  %v689_v16 = vrot.slane %v668_v1, 1 }
 0x304   :  { %v690_v8 = vrot.slane %v669_v2, 1  ;;  %v675_v9 = vrot.slane %v667_v4, 7  ;;  %v677_v10 = vrot.slane %v668_v1, 7  ;;  %v678_v11 = vrot.slane %v669_v2, 7 }
 0x305   :  { %1290 = vmatmul.mubr.msk.f32.vlgmr.msra.gmra.mrb[12].mxu0 %vm2161_vm2, %v674_v6  ;;  %v688_v58 = vsel %vm99_vm0, %v686_v5, %v687_v7 }
 0x306   :  { %815 = vmatprep.mubr.f32.mxu0 %v667_v4  ;;  %1651 = vmatprep.mubr.f32.mxu1 %v688_v58  ;;  %v691_v0 = vsel %vm99_vm0, %v689_v16, %v690_v8  ;;  %v676_v14 = vsel %vm86_vm1, %v674_v6, %v675_v9  ;;  %v679_v15 = vsel %vm86_vm1, %v677_v10, %v678_v11 }
 0x307   :  { %1652 = vmatmul.mubr.msk.f32.vlgmr.msra.gmra.mrb[8].mxu1 %vm99_vm0, %v687_v7  ;;  %1915 = vmatpush3.bf16.msra.mxu0 %v2186_v27 }
 0x308   :  { %1654 = vmatprep.mubr.f32.mxu1 %v691_v0  ;;  %1939 = vmatpush3.bf16.msra.mxu1 %v2186_v27 }
 0x309   :  { %816 = vmatmul.mubr.f32.gmra.mrb[14].mxu0 %v676_v14  ;;  %1916 = vmatprep.subr.bf16.mxu0 %v2049_v28 }
 0x30a   :  { %820 = vmatprep.mubr.f32.mxu0 %v668_v1  ;;  %1940 = vmatprep.subr.bf16.mxu1 %v2049_v28 }
 0x30b   :  { %1655 = vmatmul.mubr.msk.f32.gmra.mrb[10].mxu1 %vm99_vm0, %v690_v8  ;;  %1918 = vmatpush3.bf16.msra.mxu0 %v2200_v31 }
 0x30c   :  { %1942 = vmatpush3.bf16.msra.mxu1 %v2200_v31  ;;  %1919 = vmatprep.subr.bf16.mxu0 %v2049_v28 }
 0x30d   :  { %1292 = vmatmul.mubr.msk.f32.gmra.mrb[16].mxu0 %vm2161_vm2, %v677_v10  ;;  %1943 = vmatprep.subr.bf16.mxu1 %v2049_v28  ;;  %v916_v10 = vld [vmem:[%s2423_s5] sm:$0x1]  ;;  %s2052_s5 = smov [#allocation7]  }
 0x30e   :  { %825 = vmatprep.mubr.f32.mxu0 %v669_v2  ;;  %1724 = vmatprep.mubr.msk.f32.mxu1 %vm2050_vm3, %v2051_v52 }
 0x30f   :  { %1921 = vmatpush3.bf16.msra.mxu0 %v2212_v34 }
 0x310   :  { %1945 = vmatpush3.bf16.msra.mxu1 %v2212_v34  ;;  %1922 = vmatprep.subr.bf16.mxu0 %v2049_v28 }
 0x311   :  { %826 = vmatmul.mubr.f32.gmra.mrb[18].mxu0 %v679_v15  ;;  %1946 = vmatprep.subr.bf16.mxu1 %v2049_v28 }
 0x312   :  { %1689 = vmatprep.mubr.msk.f32.mxu0 %vm2050_vm3, %v2051_v52 }
 0x313   :  { %1924 = vmatpush3.bf16.msra.mxu0 %v2224_v37 }
 0x314   :  { %1948 = vmatpush3.bf16.msra.mxu1 %v2224_v37  ;;  %1925 = vmatprep.subr.bf16.mxu0 %v2049_v28 }
 0x315   :  { %1949 = vmatprep.subr.bf16.mxu1 %v2049_v28 }
 0x317   :  { %1927 = vmatpush3.bf16.msra.mxu0 %v2236_v40 }
 0x318   :  { %1951 = vmatpush3.bf16.msra.mxu1 %v2236_v40  ;;  %1928 = vmatprep.subr.bf16.mxu0 %v2049_v28 }
 0x319   :  { %1952 = vmatprep.subr.bf16.mxu1 %v2049_v28 }
 0x31b   :  { %1930 = vmatpush3.bf16.msra.mxu0 %v2248_v43 }
 0x31c   :  { %1954 = vmatpush3.bf16.msra.mxu1 %v2248_v43  ;;  %1931 = vmatprep.subr.bf16.mxu0 %v2049_v28 }
 0x31d   :  { %1955 = vmatprep.subr.bf16.mxu1 %v2049_v28 }
 0x31f   :  { %1933 = vmatpush3.bf16.msra.mxu0 %v2260_v46 }
 0x320   :  { %1957 = vmatpush3.bf16.msra.mxu1 %v2260_v46  ;;  %1934 = vmatprep.subr.bf16.mxu0 %v2049_v28 }
 0x321   :  { %1958 = vmatprep.subr.bf16.mxu1 %v2049_v28 }
 0x323   :  { %1936 = vmatpush3.bf16.msra.mxu0 %v2272_v51 }
 0x324   :  { %1960 = vmatpush3.bf16.msra.mxu1 %v2272_v51  ;;  %1727 = vmatprep.subr.mxu0 %v2051_v52 }
 0x325   :  { %1732 = vmatprep.subr.mxu1 %v2051_v52 }
 0x3d8   :  { %v1431_v18 = vpop.f32.mrb[12].mxu0 }
 0x3d9   :  { %v1432_v27 = vpop.f32.mrb[13].mxu0 }
 0x3da   :  { %v1433_v31 = vadd.f32 %v1432_v27, %v1431_v18  ;;  %v1653_v34 = vpop.f32.mrb[8].mxu1 }
 0x3db   :  { %v897_v37 = vpop.f32.mrb[9].mxu1 }
 0x3dc   :  { %v2377_v40 = vadd.f32 %v1433_v31, %v897_v37  ;;  %v1434_v43 = vpop.f32.mrb[14].mxu0 }
 0x3dd   :  { %v1435_v46 = vpop.f32.mrb[15].mxu0 }
 0x3de   :  { %v1436_v17 = vadd.f32 %v1435_v46, %v1434_v43  ;;  %v1656_v19 = vpop.f32.mrb[10].mxu1  ;;  %v927_v29 = vmul.f32 %v2377_v40, %v2377_v40 }
 0x3df   :  { %v907_v28 = vpop.f32.mrb[11].mxu1 }
 0x3e0   :  { %v903_v20 = vadd.f32 %v1653_v34, %v1436_v17  ;;  %v1437_v21 = vpop.f32.mrb[16].mxu0 }
 0x3e1   :  { %v1438_v22 = vpop.f32.mrb[17].mxu0 }
 0x3e2   :  { %v1439_v51 = vadd.f32 %v1438_v22, %v1437_v21  ;;  %v928_v23 = vmul.f32 %v903_v20, %v903_v20  ;;  %v918_v30 = vadd.f32 %v903_v20, %v2377_v40 }
 0x3e4   :  { %v908_v24 = vadd.f32 %v1439_v51, %v907_v28  ;;  %v1440_v25 = vpop.f32.mrb[18].mxu0  ;;  %v931_v35 = vadd.f32 %v928_v23, %v927_v29 }
 0x3e5   :  { %v1441_v26 = vpop.f32.mrb[19].mxu0 }
 0x3e6   :  { %v929_v32 = vmul.f32 %v908_v24, %v908_v24  ;;  %v1442_v33 = vadd.f32 %v1441_v26, %v1440_v25  ;;  %v919_v36 = vadd.f32 %v918_v30, %v908_v24 }
 0x3e8   :  { %v913_v38 = vadd.f32 %v1656_v19, %v1442_v33  ;;  %v932_v41 = vadd.f32 %v931_v35, %v929_v32 }
 0x3ea   :  { %v920_v44 = vadd.f32 %v919_v36, %v913_v38  ;;  %v930_v45 = vmul.f32 %v913_v38, %v913_v38 }
 0x3ec   :  { %v921_v47 = vrot.slane %v920_v44, 4  ;;  %v933_v53 = vadd.f32 %v932_v41, %v930_v45 }
 0x3ee   :  { %v922_v54 = vadd.f32 %v921_v47, %v920_v44  ;;  %v934_v55 = vrot.slane %v933_v53, 4 }
 0x3f0   :  { %v923_v56 = vrot.slane %v922_v54, 2  ;;  %v935_v57 = vadd.f32 %v934_v55, %v933_v53 }
 0x3f2   :  { %v924_v48 = vadd.f32 %v923_v56, %v922_v54  ;;  %v936_v59 = vrot.slane %v935_v57, 2 }
 0x3f4   :  { %v925_v60 = vrot.slane %v924_v48, 1  ;;  %v937_v61 = vadd.f32 %v936_v59, %v935_v57 }
 0x3f6   :  { %v926_v62 = vadd.f32 %v925_v60, %v924_v48  ;;  %v938_v63 = vrot.slane %v937_v61, 1 }
 0x3f8   :  { %1690 = vmatmul.mubr.f32.vlgmr.msra.gmra.mrb[20].mxu0 %v926_v62  ;;  %v939_v1 = vadd.f32 %v938_v63, %v937_v61 }
 0x3f9   :  { %1728 = vmatpush3.msra.mxu0 %v2309_v39  ;;  %1729 = vmatprep.mubr.msk.f32.mxu0 %vm2050_vm3, %v2051_v52 }
 0x3fa   :  { %1725 = vmatmul.mubr.f32.vlgmr.msra.gmra.mrb[12].mxu1 %v939_v1 }
 0x3fb   :  { %1733 = vmatpush3.msra.mxu1 %v2309_v39  ;;  %1734 = vmatprep.mubr.msk.f32.mxu1 %vm2050_vm3, %v2051_v52  ;;  %v917_v52 = vld [vmem:[%s2424_s6] sm:$0x1]  ;;  %s1268_s6 = sshll.u32 %s2052_s5, 4  ;;  %s1269_s6 = int_to_ptr.vmem [resolvable:$true] %s1268_s6 }
 0x3fc   :  { %s2017_s14 = scalar_lea.vmem %s1269_s6, 512  ;;  %p2022_p3 = scmp.lt.s32.totalorder %s1269_s6, %s1269_s6 }
 0x3fd   :  { %p2018_p2 = scmp.ne.s32.totalorder %s1269_s6, %s2017_s14  ;;  %p2023_p4 = scmp.lt.s32.totalorder %s2017_s14, %s2017_s14 }
 0x3ff   :  { %p2024_p5 = por %p2023_p4, %p2022_p3 }
 0x401   :  { %p2025_p6 = pnand %p2024_p5, %p2018_p2 }
 0x4cb   :  { %v1006_v2 = vpop.f32.mrb[20].mxu0 }
 0x4cc   :  { %v1080_v3 = vmul.f32 0.001953125, %v1006_v2  ;;  %v1691_v4 = vpop.f32.mrb[21].mxu0 }
 0x4cd   :  { %v1076_v6 = vpop.f32.mrb[12].mxu1 }
 0x4ce   :  { %v1082_v5 = vmul.f32 %v1080_v3, %v1080_v3  ;;  %v1081_v7 = vmul.f32 0.001953125, %v1076_v6  ;;  %v1726_v16 = vpop.f32.mrb[13].mxu1 }
 0x4d0   :  { %v1083_v8 = vsub.f32 %v1081_v7, %v1082_v5 }
 0x4d2   :  { %v1084_v9 = vadd.f32 1e-05, %v1083_v8 }
 0x4d4   :  { %1971 = vrsqrt.f32 %v1084_v9 }
 0x4de   :  { %v1972_v11 = vpop.eup %1971 }
 0x4df   :  { %v1086_v58 = vmul.f32 %v1972_v11, %v916_v10 }
 0x4e1   :  { %1730 = vmatmul.mubr.msk.f32.vlgmr.msra.gmra.mrb[22].mxu0 %vm503_vm4, %v1086_v58  ;;  %v1087_v39 = vmul.f32 %v1086_v58, %v1080_v3 }
 0x4e3   :  { %v1088_v0 = vsub.f32 %v917_v52, %v1087_v39 }
 0x4e5   :  { %1735 = vmatmul.mubr.msk.f32.vlgmr.msra.gmra.mrb[14].mxu1 %vm503_vm4, %v1088_v0 }
 0x5b4   :  { %v1158_v14 = vpop.f32.mrb[22].mxu0 }
 0x5b5   :  { %v1238_v15 = vrot.slane %v1158_v14, %v2323_v42  ;;  %v1731_v18 = vpop.f32.mrb[23].mxu0 }
 0x5b7   :  { %v1239_v27 = vmul.f32 %v1238_v15, %v2377_v40  ;;  %v1240_v34 = vmul.f32 %v1238_v15, %v903_v20  ;;  %v1241_v37 = vmul.f32 %v1238_v15, %v908_v24  ;;  %v1242_v43 = vmul.f32 %v1238_v15, %v913_v38 }
 0x5b8   :  { %v1231_v31 = vpop.f32.mrb[14].mxu1 }
 0x5b9   :  { %v1246_v46 = vrot.slane %v1231_v31, %v2323_v42  ;;  %v1736_v17 = vpop.f32.mrb[15].mxu1 }
 0x5bb   :  { %v1247_v19 = vadd.f32 %v1246_v46, %v1239_v27  ;;  %v1248_v28 = vadd.f32 %v1246_v46, %v1240_v34  ;;  %v1249_v21 = vadd.f32 %v1246_v46, %v1241_v37  ;;  %v1250_v22 = vadd.f32 %v1246_v46, %v1242_v43 }
 0x5bd   :  { %v1251_v51 = vadd.f32 %v1247_v19, %v2136_v49  ;;  %v1252_v23 = vadd.f32 %v1248_v28, %v2141_v50  ;;  %v1253_v25 = vadd.f32 %v1249_v21, %v2150_v12  ;;  %v1254_v40 = vadd.f32 %v1250_v22, %v2155_v13 }
 0x5bf   :  { %v1255_v20 = vmax.f32 %v1251_v51, 0.0  ;;  %v1256_v24 = vmax.f32 %v1252_v23, 0.0  ;;  %v1257_v26 = vmax.f32 %v1253_v25, 0.0  ;;  %v1258_v29 = vmax.f32 %v1254_v40, 0.0 }
 0x5c1   :  { %1259 = vst [vmem:[#allocation7] sm:$0xff] %v1255_v20  ;;  %1260 = vst [vmem:[#allocation7 + $0x8] sm:$0xff] %v1256_v24 }
 0x5c2   :  { %1261 = vst [vmem:[#allocation7 + $0x10] sm:$0xff] %v1257_v26  ;;  %1262 = vst [vmem:[#allocation7 + $0x18] sm:$0xff] %v1258_v29 }
 0x5c3   :  { %2028 = shalt.err (!%p2025_p6)
}
 0x5c4   :  { %s2029_s17 = scalar_lea.hbm %s2427_s9, 512 }
 0x5c5   :  { %p2030_p7 = scmp.ne.s32.totalorder %s2427_s9, %s2029_s17  ;;  %p2033_p8 = scmp.lt.u32.totalorder %s2029_s17, %s2427_s9 }
 0x5c7   :  { %p2035_p9 = pnand %p2033_p8, %p2030_p7 }
 0x5c9   :  { %2038 = shalt.err (!%p2035_p9)
}
 0x5ca   :  { %1274 = dma.vmem_to_hbm [thread:$0]  %s1269_s6, 512, %s2427_s9, [#allocation4], %s2046_s19, %s2046_s19, %s2047_s20  }
 0x5cb   :  { %2043 = dma.done.wait [#allocation4], 512  }
 0x5cc   :  { %2044 = vsyncadd [#allocation4], 4294966784 }
 0x5cd   :  { %1278 = vsyncpa [#allocation3], 1 }
 0x5ce   :  { %1279 = vsyncpa [#allocation6], 1 }
 0x5cf   :  { %1280 = vsyncpa [#allocation4], 1 }

</bundles_post_ra>
